<compile_context>
chip_gen: v7x
topology: tpu7x:2x2x1
jax: 0.10.0
libtpu: 0.0.40
codegen_flags: <defaults>
</compile_context>

<pallas_src>
import jax
import jax.numpy as jnp
from jax.experimental import pallas as pl
from jax.experimental.pallas import tpu as pltpu


def _uept_kernel(x_ref, o_ref):
    # x_ref: (tHW, tC), o_ref: (tC, tHW)  -- batch dim is Squeezed away.
    # TODO(synk): for bf16/int8 on v7x, pack adjacent elements to u32 via
    # pltpu.bitcast around the transpose so the XLU vxpose slot doesn't become
    # binding; f32 stays HBM-bound with the plain transpose.
    o_ref[...] = x_ref[...].T


def _vmem_capacity_bytes():
    try:
        return int(pltpu.get_tpu_info().vmem_capacity_bytes)
    except Exception:
        return 64 << 20  # conservative fallback: v7x-sized VMEM


def _pick_tile(dim, target):
    """Round `dim` down to a multiple of 128, capped at `target`.

    Dims < 128 use the full dim (always a legal block size).  Ragged trailing
    blocks from non-divisible dims are handled by Pallas masking.
    """
    if dim < 128:
        return dim
    return (min(dim, target) // 128) * 128


def uept_forward(x, x_size, embed_dim):
    """Pallas implementation of UEPT.forward.

    x:       (B, HW, C) array with C == embed_dim and HW == H * W
    x_size:  (H, W) python ints
    returns: (B, embed_dim, H, W) array (NCHW), same dtype as x
    """
    B, HW, C = x.shape
    H, W = x_size
    assert C == embed_dim, (C, embed_dim)
    assert HW == H * W, (HW, H, W)

    itemsize = jnp.dtype(x.dtype).itemsize

    # Degenerate / tiny inputs: kernel launch + per-step overhead dominates;
    # let XLA's fused transpose handle them.
    if HW == 1 or C == 1 or HW * C * itemsize < (64 << 10):
        return jnp.transpose(x, (0, 2, 1)).reshape(B, C, H, W)

    phys_vmem = _vmem_capacity_bytes()
    # Bigger HW tiles where VMEM is plentiful (v5e/v6e: 128 MiB); 512 on v7x.
    hw_target = 1024 if phys_vmem >= (100 << 20) else 512
    tHW = _pick_tile(HW, hw_target)
    tC = _pick_tile(C, 512)
    nHW = pl.cdiv(HW, tHW)
    nC = pl.cdiv(C, tC)

    # VMEM footprint: double-buffered input block + double-buffered output block.
    needed_vmem = 4 * tHW * tC * itemsize
    vmem_cap = int(0.75 * phys_vmem)
    assert needed_vmem <= vmem_cap, (
        f"UEPT tile footprint {needed_vmem} B exceeds VMEM budget {vmem_cap} B"
    )
    vmem_limit = int(min(vmem_cap, max(2 * needed_vmem, 32 << 20)))

    # Grid ordering: HW-block axis innermost (store locality); lead with the
    # larger of (C-blocks, B) for balanced v7x megacore sharding.
    if nC >= B:
        grid = (nC, B, nHW)
        in_map = lambda j, b, i: (b, i, j)
        out_map = lambda j, b, i: (b, j, i)
    else:
        grid = (B, nC, nHW)
        in_map = lambda b, j, i: (b, i, j)
        out_map = lambda b, j, i: (b, j, i)

    out_bc_hw = pl.pallas_call(
        _uept_kernel,
        out_shape=jax.ShapeDtypeStruct((B, C, HW), x.dtype),
        grid_spec=pl.GridSpec(
            grid=grid,
            in_specs=[pl.BlockSpec((pl.Squeezed(), tHW, tC), in_map)],
            out_specs=pl.BlockSpec((pl.Squeezed(), tC, tHW), out_map),
        ),
        compiler_params=pltpu.CompilerParams(
            dimension_semantics=("parallel", "parallel", "parallel"),
            vmem_limit_bytes=vmem_limit,
        ),
    )(x)

    # Free row-major view: (B, C, HW) -> (B, C, H, W)  (matches torch .view).
    return out_bc_hw.reshape(B, C, H, W)


if __name__ == "__main__":
    key = jax.random.PRNGKey(0)

    # --- Case 1: small, module-consistent shapes (tiny-input fast path) ---
    B = 2
    H, W = 8, 8
    HW = H * W
    embed_dim = 32
    x = jax.random.normal(key, (B, HW, embed_dim), dtype=jnp.float32)

    out = uept_forward(x, (H, W), embed_dim)
    out = jax.block_until_ready(out)
    ref = jnp.transpose(x, (0, 2, 1)).reshape(B, embed_dim, H, W)
    assert out.shape == (B, embed_dim, H, W)
    assert out.dtype == x.dtype
    assert jnp.array_equal(out, ref)

    # --- Case 2: lane-aligned shapes exercising the Pallas tiled path ---
    B2 = 2
    H2, W2 = 32, 32          # HW = 1024
    HW2 = H2 * W2
    embed_dim2 = 256
    x2 = jax.random.normal(jax.random.PRNGKey(0), (B2, HW2, embed_dim2),
                           dtype=jnp.float32)

    out2 = uept_forward(x2, (H2, W2), embed_dim2)
    out2 = jax.block_until_ready(out2)
    ref2 = jnp.transpose(x2, (0, 2, 1)).reshape(B2, embed_dim2, H2, W2)
    assert out2.shape == (B2, embed_dim2, H2, W2)
    assert out2.dtype == x2.dtype
    assert jnp.array_equal(out2, ref2)

    # --- Case 3: non-128-multiple dims exercising the masked ragged blocks ---
    B3 = 2
    H3, W3 = 14, 14          # HW = 196 -> tHW = 128, ragged last block
    HW3 = H3 * W3
    embed_dim3 = 192         # tC = 128, ragged last block
    x3 = jax.random.normal(jax.random.PRNGKey(0), (B3, HW3, embed_dim3),
                           dtype=jnp.float32)

    out3 = uept_forward(x3, (H3, W3), embed_dim3)
    out3 = jax.block_until_ready(out3)
    ref3 = jnp.transpose(x3, (0, 2, 1)).reshape(B3, embed_dim3, H3, W3)
    assert out3.shape == (B3, embed_dim3, H3, W3)
    assert out3.dtype == x3.dtype
    assert jnp.array_equal(out3, ref3)

    print("KERNEL_OK")
</pallas_src>

<mosaic_0001>
module attributes {stable_mosaic.version = 11 : i64} {
  func.func @_uept_kernel(%arg0: i32, %arg1: i32, %arg2: i32, %arg3: memref<1x512x256xf32, #tpu.memory_space<vmem>>, %arg4: memref<1x256x512xf32, #tpu.memory_space<vmem>>) attributes {dimension_semantics = [#tpu.dimension_semantics<parallel>, #tpu.dimension_semantics<parallel>, #tpu.dimension_semantics<parallel>], iteration_bounds = array<i64: 2, 1, 2>, scalar_prefetch = 0 : i64, scratch_operands = 0 : i64, tpu.core_type = #tpu.core_type<tc>, window_params = [{transform_indices = @transform_0, window_bounds = array<i64: 1, 512, 256>}, {transform_indices = @transform_1, window_bounds = array<i64: 1, 256, 512>}]} {
    %c0 = arith.constant 0 : index
    %c0_0 = arith.constant 0 : index
    %c0_1 = arith.constant 0 : index
    %0 = vector.load %arg3[%c0, %c0_0, %c0_1] : memref<1x512x256xf32, #tpu.memory_space<vmem>>, vector<1x512x256xf32>
    %1 = vector.shape_cast %0 : vector<1x512x256xf32> to vector<512x256xf32>
    %2 = tpu.transpose %1, [1, 0] : vector<512x256xf32> -> vector<256x512xf32>
    %c0_2 = arith.constant 0 : index
    %c0_3 = arith.constant 0 : index
    %c0_4 = arith.constant 0 : index
    %3 = vector.load %arg4[%c0_2, %c0_3, %c0_4] : memref<1x256x512xf32, #tpu.memory_space<vmem>>, vector<1x256x512xf32>
    %4 = vector.shape_cast %3 : vector<1x256x512xf32> to vector<256x512xf32>
    %5 = vector.shape_cast %2 : vector<256x512xf32> to vector<1x256x512xf32>
    tpu.vector_store %arg4[%c0_2, %c0_3, %c0_4], %5 {strides = array<i32>} : memref<1x256x512xf32, #tpu.memory_space<vmem>>, vector<1x256x512xf32>,
    return
  }
  func.func @transform_0(%arg0: i32, %arg1: i32, %arg2: i32) -> (i32, i32, i32) {
    %c0_i32 = arith.constant 0 : i32
    return %arg0, %arg2, %arg1 : i32, i32, i32
  }
  func.func @transform_1(%arg0: i32, %arg1: i32, %arg2: i32) -> (i32, i32, i32) {
    %c0_i32 = arith.constant 0 : i32
    return %arg0, %arg1, %arg2 : i32, i32, i32
  }
}

</mosaic_0001>

<bundles_post_ra>
// kernel: tpu_custom_call.1
= control target key start
LH: loop header
LB: loop body
LE: loop exit
PB: predicated region body
PF: predicated region fallthrough
CT: control target
= control target key end

     0   :  { %6 = vsyncpa [#allocation3], 0  ;;  %s1508_s0 = inlined_call_operand.hbm [shape: f32[2,1024,256], index: 0, kind: input, shape index: {}]   ;;  %s1509_s1 = inlined_call_operand.hbm [shape: f32[2,256,1024], index: 1, kind: output, shape index: {}]  }
   0x1   :  { %8 = vsyncpa [#allocation3 + $0x1], 0 }
   0x2   :  { %9 = vsyncpa [#allocation4], 0 }
   0x3   :  { %11 = vsyncpa [#allocation4 + $0x1], 0  ;;  %s1048_s6 = smov 0   ;;  %s1050_s7 = smov 0  }
   0x4   :  { %s1052_s8 = smov 0   ;;  %s1054_s9 = smov 0  }
   0x5   :  { %s1056_s10 = smov 0   ;;  %s1058_s11 = smov 0  }
   0x6   :  { %s1060_s12 = smov 0   ;;  %s1062_s13 = smov 0  }
   0x7 LB: > { %s799_s14 = sadd.s32 4294967295, %s1029_s13   ;;  %s800_s15 = sadd.s32 4294967294, %s1029_s13   ;;  %s1029_s13 = sphi %s1062_s13, %s17_s13   ;;  %s1025_s12 = sphi %s1060_s12, %s1524_s12   ;;  %s1021_s11 = sphi %s1058_s11, %s1523_s11   ;;  %s1017_s10 = sphi %s1056_s10, %s1522_s10   ;;  %s1013_s9 = sphi %s1054_s9, %s1521_s9   ;;  %s1009_s8 = sphi %s1052_s8, %s1520_s8   ;;  %s1005_s7 = sphi %s1050_s7, %s1519_s7   ;;  %s1001_s6 = sphi %s1048_s6, %s1518_s6  }
   0x8   : > { %s29_s16 = sadd.s32 1, %s1021_s11  ;;  %s36_s17 = sadd.s32 1, %s1025_s12 }
   0x9   : > { %p30_p0 = scmp.ge.s32.totalorder %s29_s16, 2  ;;  %s47_s18 = sadd.s32 1, %s1009_s8 }
   0xa   : > { %p54_p1 = scmp.ne.s32.totalorder %s1009_s8, %s1005_s7  ;;  %p55_p2 = scmp.eq.s32.totalorder %s1029_s13, 0 }
   0xb   : > { %s1526_s16 = smov (%p30_p0, %s29_s16), 0  ;;  %s1528_s17 = smov (!%p30_p0, %s36_s17), %s1025_s12 }
   0xc   : > { %s41_s19 = ssub.s32 %s1021_s11, %s1526_s16  ;;  %p1101_p3 = por %p55_p2, %p54_p1 }
   0xd   : > { %p38_p4 = scmp.ge.s32.totalorder %s1528_s17, 2  ;;  %p60_p5 = scmp.ne.s32.totalorder %s1005_s7, %s1001_s6 }
   0xe   : > { %p61_p6 = scmp.eq.s32.totalorder %s799_s14, 0  ;;  %p88_p7 = scmp.eq.s32.totalorder %s799_s14, 3 }
   0xf   : > { %s1530_s17 = smov (%p38_p4, %s1528_s17), 0  ;;  %p94_p10 = scmp.eq.s32.totalorder %s800_s15, 3 }
  0x10   : > { %p1109_p8 = por %p61_p6, %p60_p5  ;;  %p1113_p9 = por %p88_p7, %p54_p1 }
  0x11   : > { %s40_s23 = ssub.s32 %s1025_s12, %s1530_s17  ;;  %p1119_p12 = por %p94_p10, %p60_p5 }
  0x12   : > { %s1513_s22 = scalar_select %p1113_p9, 1, 0 }
  0x13   : > { %s42_s24 = sor.u32 %s41_s19, %s40_s23  ;;  %p830_p13 = scmp.lt.s32.totalorder %s1029_s13, 4 }
  0x14   : > { %p45_p11 = scmp.eq.s32.totalorder %s42_s24, 0  ;;  %s114_s26 = sand.u32 1, %s1009_s8  }
  0x15   : > { %s1514_s25 = scalar_select %p1119_p12, 1, 0 }
  0x16   : > { %s1126_s27 = scalar_select %p45_p11, %s1009_s8, %s47_s18  }
  0x17   : > { %s803_s28 = sshll.u32 %s114_s26, 10  ;;  %s817_s29 = sshll.u32 %s1021_s11, 7 }
  0x18   : > { %s806_s30 = sshll.u32 %s1025_s12, 8  ;;  %s118_s2 = scalar_lea.vmem [#allocation2], %s803_s28 }
  0x19   : > { %s130_s3 = sshll.u32 %s118_s2, 4  ;;  %s127_s4 = sadd.s32 %s817_s29, %s806_s30  ;;  %s1130_s3 = int_to_ptr.vmem [resolvable:$true] %s130_s3 }
  0x1a   : > { %s807_s5 = sshll.u32 %s127_s4, 7  ;;  %p1134_p0 = pnand %p830_p13, %p1101_p3 }
  0x1b   : > { %s1141_s18 = scalar_lea.hbm %s1508_s0, %s807_s5  ;;  %s1143_s23 = scalar_lea.sflag [#allocation3], %s114_s26 }
  0x1c   : > { %s901_s24 = scalar_lea.hbm %s1141_s18, 16384  ;;  %p903_p2 = pneg %p1134_p0 }
  0x1d   : > { %p902_p1 = scmp.ne.s32.totalorder %s1141_s18, %s901_s24  ;;  %s906_s29 = scalar_lea.hbm %s1508_s0, 65536 }
  0x1e   : > { %p907_p5 = scmp.lt.u32.totalorder %s1141_s18, %s1508_s0  ;;  %p908_p6 = scmp.lt.u32.totalorder %s906_s29, %s901_s24 }
  0x1f   : > { %p904_p3 = pnand %p903_p2, %p902_p1  ;;  %p910_p10 = scmp.lt.u32.totalorder %s901_s24, %s1141_s18 }
  0x20   : > { %p909_p7 = por %p908_p6, %p907_p5 }
  0x21   : > { %p905_p4 = pneg %p904_p3 }
  0x22   : > { %p911_p11 = por %p910_p10, %p909_p7 }
  0x24   : > { %p912_p13 = pnand %p911_p11, %p905_p4 }
  0x26   : > { %915 = shalt.err (!%p912_p13)
}
  0x27   : > { %s916_s26 = scalar_lea.vmem %s1130_s3, 16384  ;;  %s1031_s4 = smov [#allocation2]  }
  0x28   : > { %p917_p1 = scmp.ne.s32.totalorder %s1130_s3, %s916_s26  ;;  %s921_s5 = sshll.u32 %s1031_s4, 4  ;;  %s922_s5 = int_to_ptr.vmem [resolvable:$false] %s921_s5 }
  0x29   : > { %s923_s15 = scalar_lea.vmem %s922_s5, 32768  ;;  %p924_p9 = scmp.lt.s32.totalorder %s1130_s3, %s922_s5 }
  0x2a   : > { %p919_p3 = pnand %p917_p1, %p903_p2  ;;  %p925_p5 = scmp.lt.s32.totalorder %s923_s15, %s916_s26 }
  0x2c   : > { %p920_p12 = pneg %p919_p3  ;;  %p926_p6 = por %p925_p5, %p924_p9 }
  0x2e   : > { %p927_p7 = pnand %p926_p6, %p920_p12 }
  0x30   : > { %930 = shalt.err (!%p927_p7)
}
  0x31   : > { %s1032_s19 = smov 256   ;;  %s1033_s24 = smov 16  }
  0x32   : > { %825 = dma.hbm_to_vmem [thread:$0]  (!%p1134_p0), %s1141_s18, 16384, %s1130_s3, %s1143_s23, %s1032_s19, %s1032_s19, %s1033_s24  }
  0x33   : > { %p808_p2 = scmp.ge.s32.totalorder %s1029_s13, 1  ;;  %p138_p4 = scmp.lt.s32.totalorder %s1029_s13, 5 }
  0x35   : > { %p139_p10 = pnand %p808_p2, %p138_p4 }
  0x36   : > { %s1174_s20 = sand.u32 (!%p139_p10), 1, %s1005_s7  }
  0x37   : > { %142 = sbr.rel (%p139_p10) target bundleno = 461 (0x1cd), region = 24  ;;  %s809_s28 = sshll.u32 (!%p139_p10), %s1174_s20, 10 }
  0x38   : > { %s145_s29 = scalar_lea.sflag (!%p139_p10), [#allocation3], %s1174_s20  ;;  %s1180_s30 = scalar_lea.vmem (!%p139_p10), [#allocation2], %s809_s28 }
  0x3e   : > { %992 = dma.done.wait (%p1109_p8), %s145_s29, 16384  }
  0x3f   : > { %994 = vsyncadd (%p1109_p8), %s145_s29, 4294950912  ;;  %v172_v0 = vld [vmem:[%s1180_s30 + $0x8] sm:$0xff]  ;;  %v171_v1 = vld [vmem:[%s1180_s30] sm:$0xff]  ;;  %s1254_s21 = scalar_lea.vmem [#allocation5], %s809_s28  ;;  %s812_s3 = sshll.u32 %s1013_s9, 2 }
  0x40   : > { %331 = vxpose.xlu1.b32.start [1/16] %v172_v0, 128  ;;  %299 = vxpose.xlu0.b32.start [1/16] %v171_v1, 128  ;;  %v174_v2 = vld [vmem:[%s1180_s30 + $0x18] sm:$0xff]  ;;  %v173_v3 = vld [vmem:[%s1180_s30 + $0x10] sm:$0xff]  ;;  %v176_v4 = vld [vmem:[%s1180_s30 + $0x28] sm:$0xff]  ;;  %s813_s14 = sshll.u32 %s1017_s10, 8  ;;  %s702_s2 = sshll.u32 %s1254_s21, 4  ;;  %s1452_s2 = int_to_ptr.vmem [resolvable:$true] %s702_s2 }
  0x41   : > { %v175_v5 = vld [vmem:[%s1180_s30 + $0x20] sm:$0xff]  ;;  %v178_v6 = vld [vmem:[%s1180_s30 + $0x38] sm:$0xff]  ;;  %v177_v7 = vld [vmem:[%s1180_s30 + $0x30] sm:$0xff]  ;;  %s699_s18 = sadd.s32 %s813_s14, %s812_s3  ;;  %s684_s4 = scalar_lea.sflag [#allocation4], %s1174_s20 }
  0x42   : > { %v180_v8 = vld [vmem:[%s1180_s30 + $0x48] sm:$0xff]  ;;  %v179_v9 = vld [vmem:[%s1180_s30 + $0x40] sm:$0xff]  ;;  %v182_v10 = vld [vmem:[%s1180_s30 + $0x58] sm:$0xff]  ;;  %s814_s23 = sshll.u32 %s699_s18, 7  ;;  %s931_s5 = scalar_lea.vmem %s1452_s2, 16384 }
  0x43   : > { %v181_v11 = vld [vmem:[%s1180_s30 + $0x50] sm:$0xff]  ;;  %v184_v12 = vld [vmem:[%s1180_s30 + $0x68] sm:$0xff]  ;;  %v183_v13 = vld [vmem:[%s1180_s30 + $0x60] sm:$0xff]  ;;  %s1450_s10 = scalar_lea.hbm %s1509_s1, %s814_s23  ;;  %p932_p8 = scmp.ne.s32.totalorder %s1452_s2, %s931_s5 }
  0x44   : > { %332 = vxpose.xlu1.b32.cont [2/16] %v174_v2, 128  ;;  %300 = vxpose.xlu0.b32.cont [2/16] %v173_v3, 128  ;;  %v186_v14 = vld [vmem:[%s1180_s30 + $0x78] sm:$0xff]  ;;  %v185_v15 = vld [vmem:[%s1180_s30 + $0x70] sm:$0xff]  ;;  %v188_v16 = vld [vmem:[%s1180_s30 + $0x88] sm:$0xff]  ;;  %p1516_p9 = scmp.ne.s32.totalorder %s1513_s22, 0  ;;  %s1034_s15 = smov [#allocation5]  }
  0x45   : > { %v187_v17 = vld [vmem:[%s1180_s30 + $0x80] sm:$0xff]  ;;  %v190_v18 = vld [vmem:[%s1180_s30 + $0x98] sm:$0xff]  ;;  %v189_v19 = vld [vmem:[%s1180_s30 + $0x90] sm:$0xff]  ;;  %s935_s19 = sshll.u32 %s1034_s15, 4  ;;  %s936_s19 = int_to_ptr.vmem [resolvable:$false] %s935_s19 }
  0x46   : > { %v192_v20 = vld [vmem:[%s1180_s30 + $0xa8] sm:$0xff]  ;;  %v191_v21 = vld [vmem:[%s1180_s30 + $0xa0] sm:$0xff]  ;;  %v194_v22 = vld [vmem:[%s1180_s30 + $0xb8] sm:$0xff]  ;;  %p933_p12 = pnand %p932_p8, %p1516_p9  ;;  %s937_s24 = scalar_lea.vmem %s936_s19, 32768 }
  0x47   : > { %v193_v23 = vld [vmem:[%s1180_s30 + $0xb0] sm:$0xff]  ;;  %v196_v24 = vld [vmem:[%s1180_s30 + $0xc8] sm:$0xff]  ;;  %v195_v25 = vld [vmem:[%s1180_s30 + $0xc0] sm:$0xff]  ;;  %p938_p11 = scmp.lt.s32.totalorder %s1452_s2, %s936_s19  ;;  %p939_p13 = scmp.lt.s32.totalorder %s937_s24, %s931_s5 }
  0x48   : > { %333 = vxpose.xlu1.b32.cont [3/16] %v176_v4, 128  ;;  %301 = vxpose.xlu0.b32.cont [3/16] %v175_v5, 128  ;;  %v198_v26 = vld [vmem:[%s1180_s30 + $0xd8] sm:$0xff]  ;;  %v197_v27 = vld [vmem:[%s1180_s30 + $0xd0] sm:$0xff]  ;;  %v200_v28 = vld [vmem:[%s1180_s30 + $0xe8] sm:$0xff]  ;;  %p934_p0 = pneg %p933_p12 }
  0x49   : > { %v199_v29 = vld [vmem:[%s1180_s30 + $0xe0] sm:$0xff]  ;;  %v202_v30 = vld [vmem:[%s1180_s30 + $0xf8] sm:$0xff]  ;;  %v201_v31 = vld [vmem:[%s1180_s30 + $0xf0] sm:$0xff]  ;;  %p940_p1 = por %p939_p13, %p938_p11 }
  0x4a   : > { %v204_v32 = vld [vmem:[%s1180_s30 + $0x108] sm:$0xff]  ;;  %v203_v33 = vld [vmem:[%s1180_s30 + $0x100] sm:$0xff]  ;;  %v206_v34 = vld [vmem:[%s1180_s30 + $0x118] sm:$0xff] }
  0x4b   : > { %v205_v35 = vld [vmem:[%s1180_s30 + $0x110] sm:$0xff]  ;;  %v208_v36 = vld [vmem:[%s1180_s30 + $0x128] sm:$0xff]  ;;  %v207_v37 = vld [vmem:[%s1180_s30 + $0x120] sm:$0xff]  ;;  %p941_p3 = pnand %p940_p1, %p934_p0 }
  0x4c   : > { %334 = vxpose.xlu1.b32.cont [4/16] %v178_v6, 128  ;;  %302 = vxpose.xlu0.b32.cont [4/16] %v177_v7, 128  ;;  %v210_v38 = vld [vmem:[%s1180_s30 + $0x138] sm:$0xff]  ;;  %v209_v39 = vld [vmem:[%s1180_s30 + $0x130] sm:$0xff]  ;;  %v212_v40 = vld [vmem:[%s1180_s30 + $0x148] sm:$0xff] }
  0x4d   : > { %v211_v41 = vld [vmem:[%s1180_s30 + $0x140] sm:$0xff]  ;;  %v214_v42 = vld [vmem:[%s1180_s30 + $0x158] sm:$0xff]  ;;  %v213_v43 = vld [vmem:[%s1180_s30 + $0x150] sm:$0xff] }
  0x4e   : > { %v216_v44 = vld [vmem:[%s1180_s30 + $0x168] sm:$0xff]  ;;  %v215_v45 = vld [vmem:[%s1180_s30 + $0x160] sm:$0xff]  ;;  %v218_v46 = vld [vmem:[%s1180_s30 + $0x178] sm:$0xff] }
  0x4f   : > { %v217_v47 = vld [vmem:[%s1180_s30 + $0x170] sm:$0xff]  ;;  %v220_v48 = vld [vmem:[%s1180_s30 + $0x188] sm:$0xff]  ;;  %v219_v49 = vld [vmem:[%s1180_s30 + $0x180] sm:$0xff] }
  0x50   : > { %335 = vxpose.xlu1.b32.cont [5/16] %v180_v8, 128  ;;  %303 = vxpose.xlu0.b32.cont [5/16] %v179_v9, 128  ;;  %v222_v50 = vld [vmem:[%s1180_s30 + $0x198] sm:$0xff]  ;;  %v221_v51 = vld [vmem:[%s1180_s30 + $0x190] sm:$0xff]  ;;  %v224_v52 = vld [vmem:[%s1180_s30 + $0x1a8] sm:$0xff] }
  0x51   : > { %v223_v53 = vld [vmem:[%s1180_s30 + $0x1a0] sm:$0xff]  ;;  %v226_v54 = vld [vmem:[%s1180_s30 + $0x1b8] sm:$0xff]  ;;  %v225_v55 = vld [vmem:[%s1180_s30 + $0x1b0] sm:$0xff] }
  0x52   : > { %v228_v56 = vld [vmem:[%s1180_s30 + $0x1c8] sm:$0xff]  ;;  %v227_v57 = vld [vmem:[%s1180_s30 + $0x1c0] sm:$0xff]  ;;  %v230_v58 = vld [vmem:[%s1180_s30 + $0x1d8] sm:$0xff] }
  0x53   : > { %v229_v59 = vld [vmem:[%s1180_s30 + $0x1d0] sm:$0xff]  ;;  %v232_v60 = vld [vmem:[%s1180_s30 + $0x1e8] sm:$0xff]  ;;  %v231_v61 = vld [vmem:[%s1180_s30 + $0x1e0] sm:$0xff] }
  0x54   : > { %336 = vxpose.xlu1.b32.cont [6/16] %v182_v10, 128  ;;  %304 = vxpose.xlu0.b32.cont [6/16] %v181_v11, 128  ;;  %v234_v62 = vld [vmem:[%s1180_s30 + $0x1f8] sm:$0xff]  ;;  %v233_v63 = vld [vmem:[%s1180_s30 + $0x1f0] sm:$0xff]  ;;  %v236_v0 = vld [vmem:[%s1180_s30 + $0x208] sm:$0xff] }
  0x55   : > { %v235_v1 = vld [vmem:[%s1180_s30 + $0x200] sm:$0xff]  ;;  %v238_v4 = vld [vmem:[%s1180_s30 + $0x218] sm:$0xff]  ;;  %v237_v5 = vld [vmem:[%s1180_s30 + $0x210] sm:$0xff] }
  0x56   : > { %v240_v8 = vld [vmem:[%s1180_s30 + $0x228] sm:$0xff]  ;;  %v239_v9 = vld [vmem:[%s1180_s30 + $0x220] sm:$0xff] }
  0x58   : > { %337 = vxpose.xlu1.b32.cont [7/16] %v184_v12, 128  ;;  %305 = vxpose.xlu0.b32.cont [7/16] %v183_v13, 128  ;;  %v242_v12 = vld [vmem:[%s1180_s30 + $0x238] sm:$0xff]  ;;  %v241_v13 = vld [vmem:[%s1180_s30 + $0x230] sm:$0xff] }
  0x5c   : > { %338 = vxpose.xlu1.b32.cont [8/16] %v186_v14, 128  ;;  %306 = vxpose.xlu0.b32.cont [8/16] %v185_v15, 128 }
  0x60   : > { %339 = vxpose.xlu1.b32.cont [9/16] %v188_v16, 128  ;;  %307 = vxpose.xlu0.b32.cont [9/16] %v187_v17, 128  ;;  %v244_v16 = vld [vmem:[%s1180_s30 + $0x248] sm:$0xff]  ;;  %v243_v17 = vld [vmem:[%s1180_s30 + $0x240] sm:$0xff] }
  0x64   : > { %340 = vxpose.xlu1.b32.cont [10/16] %v190_v18, 128  ;;  %308 = vxpose.xlu0.b32.cont [10/16] %v189_v19, 128 }
  0x68   : > { %341 = vxpose.xlu1.b32.cont [11/16] %v192_v20, 128  ;;  %309 = vxpose.xlu0.b32.cont [11/16] %v191_v21, 128  ;;  %v246_v20 = vld [vmem:[%s1180_s30 + $0x258] sm:$0xff]  ;;  %v245_v21 = vld [vmem:[%s1180_s30 + $0x250] sm:$0xff] }
  0x6c   : > { %342 = vxpose.xlu1.b32.cont [12/16] %v194_v22, 128  ;;  %310 = vxpose.xlu0.b32.cont [12/16] %v193_v23, 128 }
  0x70   : > { %343 = vxpose.xlu1.b32.cont [13/16] %v196_v24, 128  ;;  %311 = vxpose.xlu0.b32.cont [13/16] %v195_v25, 128  ;;  %v248_v24 = vld [vmem:[%s1180_s30 + $0x268] sm:$0xff]  ;;  %v247_v25 = vld [vmem:[%s1180_s30 + $0x260] sm:$0xff] }
  0x74   : > { %344 = vxpose.xlu1.b32.cont [14/16] %v198_v26, 128  ;;  %312 = vxpose.xlu0.b32.cont [14/16] %v197_v27, 128 }
  0x78   : > { %345 = vxpose.xlu1.b32.cont [15/16] %v200_v28, 128  ;;  %313 = vxpose.xlu0.b32.cont [15/16] %v199_v29, 128  ;;  %v250_v28 = vld [vmem:[%s1180_s30 + $0x278] sm:$0xff]  ;;  %v249_v29 = vld [vmem:[%s1180_s30 + $0x270] sm:$0xff] }
  0x7c   : > { %346 = vxpose.xlu1.b32.end [16/16] %v202_v30, 128  ;;  %314 = vxpose.xlu0.b32.end [16/16] %v201_v31, 128 }
  0x80   : > { %395 = vxpose.xlu1.b32.start [1/16] %v204_v32, 128  ;;  %363 = vxpose.xlu0.b32.start [1/16] %v203_v33, 128  ;;  %v252_v32 = vld [vmem:[%s1180_s30 + $0x288] sm:$0xff]  ;;  %v251_v33 = vld [vmem:[%s1180_s30 + $0x280] sm:$0xff] }
  0x84   : > { %396 = vxpose.xlu1.b32.cont [2/16] %v206_v34, 128  ;;  %364 = vxpose.xlu0.b32.cont [2/16] %v205_v35, 128 }
  0x88   : > { %397 = vxpose.xlu1.b32.cont [3/16] %v208_v36, 128  ;;  %365 = vxpose.xlu0.b32.cont [3/16] %v207_v37, 128  ;;  %v254_v36 = vld [vmem:[%s1180_s30 + $0x298] sm:$0xff]  ;;  %v253_v37 = vld [vmem:[%s1180_s30 + $0x290] sm:$0xff] }
  0x8c   : > { %398 = vxpose.xlu1.b32.cont [4/16] %v210_v38, 128  ;;  %366 = vxpose.xlu0.b32.cont [4/16] %v209_v39, 128 }
  0x90   : > { %399 = vxpose.xlu1.b32.cont [5/16] %v212_v40, 128  ;;  %367 = vxpose.xlu0.b32.cont [5/16] %v211_v41, 128  ;;  %v256_v40 = vld [vmem:[%s1180_s30 + $0x2a8] sm:$0xff]  ;;  %v255_v41 = vld [vmem:[%s1180_s30 + $0x2a0] sm:$0xff] }
  0x94   : > { %400 = vxpose.xlu1.b32.cont [6/16] %v214_v42, 128  ;;  %368 = vxpose.xlu0.b32.cont [6/16] %v213_v43, 128 }
  0x98   : > { %401 = vxpose.xlu1.b32.cont [7/16] %v216_v44, 128  ;;  %369 = vxpose.xlu0.b32.cont [7/16] %v215_v45, 128  ;;  %v258_v44 = vld [vmem:[%s1180_s30 + $0x2b8] sm:$0xff]  ;;  %v257_v45 = vld [vmem:[%s1180_s30 + $0x2b0] sm:$0xff] }
  0x9c   : > { %402 = vxpose.xlu1.b32.cont [8/16] %v218_v46, 128  ;;  %370 = vxpose.xlu0.b32.cont [8/16] %v217_v47, 128 }
  0xa0   : > { %403 = vxpose.xlu1.b32.cont [9/16] %v220_v48, 128  ;;  %371 = vxpose.xlu0.b32.cont [9/16] %v219_v49, 128  ;;  %v260_v48 = vld [vmem:[%s1180_s30 + $0x2c8] sm:$0xff]  ;;  %v259_v49 = vld [vmem:[%s1180_s30 + $0x2c0] sm:$0xff] }
  0xa4   : > { %404 = vxpose.xlu1.b32.cont [10/16] %v222_v50, 128  ;;  %372 = vxpose.xlu0.b32.cont [10/16] %v221_v51, 128 }
  0xa8   : > { %405 = vxpose.xlu1.b32.cont [11/16] %v224_v52, 128  ;;  %373 = vxpose.xlu0.b32.cont [11/16] %v223_v53, 128  ;;  %v262_v52 = vld [vmem:[%s1180_s30 + $0x2d8] sm:$0xff]  ;;  %v261_v53 = vld [vmem:[%s1180_s30 + $0x2d0] sm:$0xff] }
  0xac   : > { %406 = vxpose.xlu1.b32.cont [12/16] %v226_v54, 128  ;;  %374 = vxpose.xlu0.b32.cont [12/16] %v225_v55, 128 }
  0xb0   : > { %407 = vxpose.xlu1.b32.cont [13/16] %v228_v56, 128  ;;  %375 = vxpose.xlu0.b32.cont [13/16] %v227_v57, 128  ;;  %v264_v56 = vld [vmem:[%s1180_s30 + $0x2e8] sm:$0xff]  ;;  %v263_v57 = vld [vmem:[%s1180_s30 + $0x2e0] sm:$0xff] }
  0xb4   : > { %408 = vxpose.xlu1.b32.cont [14/16] %v230_v58, 128  ;;  %376 = vxpose.xlu0.b32.cont [14/16] %v229_v59, 128 }
  0xb8   : > { %409 = vxpose.xlu1.b32.cont [15/16] %v232_v60, 128  ;;  %377 = vxpose.xlu0.b32.cont [15/16] %v231_v61, 128  ;;  %v266_v60 = vld [vmem:[%s1180_s30 + $0x2f8] sm:$0xff]  ;;  %v265_v61 = vld [vmem:[%s1180_s30 + $0x2f0] sm:$0xff] }
  0xbc   : > { %410 = vxpose.xlu1.b32.end [16/16] %v234_v62, 128  ;;  %378 = vxpose.xlu0.b32.end [16/16] %v233_v63, 128 }
  0xc0   : > { %459 = vxpose.xlu1.b32.start [1/16] %v236_v0, 128  ;;  %v347_v2 = vpop.trf.xlu1  ;;  %427 = vxpose.xlu0.b32.start [1/16] %v235_v1, 128  ;;  %v315_v3 = vpop.trf.xlu0  ;;  %v268_v0 = vld [vmem:[%s1180_s30 + $0x308] sm:$0xff]  ;;  %v267_v1 = vld [vmem:[%s1180_s30 + $0x300] sm:$0xff] }
  0xc1   : > { %619 = vst [vmem:[%s1254_s21 + $0x200] sm:$0xff] %v347_v2  ;;  %555 = vst [vmem:[%s1254_s21] sm:$0xff] %v315_v3 }
  0xc4   : > { %460 = vxpose.xlu1.b32.cont [2/16] %v238_v4, 128  ;;  %v348_v6 = vpop.trf.xlu1  ;;  %428 = vxpose.xlu0.b32.cont [2/16] %v237_v5, 128  ;;  %v316_v7 = vpop.trf.xlu0  ;;  %v270_v4 = vld [vmem:[%s1180_s30 + $0x318] sm:$0xff]  ;;  %v269_v5 = vld [vmem:[%s1180_s30 + $0x310] sm:$0xff] }
  0xc5   : > { %623 = vst [vmem:[%s1254_s21 + $0x220] sm:$0xff] %v348_v6  ;;  %559 = vst [vmem:[%s1254_s21 + $0x20] sm:$0xff] %v316_v7 }
  0xc8   : > { %461 = vxpose.xlu1.b32.cont [3/16] %v240_v8, 128  ;;  %v349_v10 = vpop.trf.xlu1  ;;  %429 = vxpose.xlu0.b32.cont [3/16] %v239_v9, 128  ;;  %v317_v11 = vpop.trf.xlu0  ;;  %v272_v8 = vld [vmem:[%s1180_s30 + $0x328] sm:$0xff]  ;;  %v271_v9 = vld [vmem:[%s1180_s30 + $0x320] sm:$0xff] }
  0xc9   : > { %627 = vst [vmem:[%s1254_s21 + $0x240] sm:$0xff] %v349_v10  ;;  %563 = vst [vmem:[%s1254_s21 + $0x40] sm:$0xff] %v317_v11 }
  0xcc   : > { %462 = vxpose.xlu1.b32.cont [4/16] %v242_v12, 128  ;;  %v350_v14 = vpop.trf.xlu1  ;;  %430 = vxpose.xlu0.b32.cont [4/16] %v241_v13, 128  ;;  %v318_v15 = vpop.trf.xlu0  ;;  %v274_v12 = vld [vmem:[%s1180_s30 + $0x338] sm:$0xff]  ;;  %v273_v13 = vld [vmem:[%s1180_s30 + $0x330] sm:$0xff] }
  0xcd   : > { %631 = vst [vmem:[%s1254_s21 + $0x260] sm:$0xff] %v350_v14  ;;  %567 = vst [vmem:[%s1254_s21 + $0x60] sm:$0xff] %v318_v15 }
  0xd0   : > { %463 = vxpose.xlu1.b32.cont [5/16] %v244_v16, 128  ;;  %v351_v18 = vpop.trf.xlu1  ;;  %431 = vxpose.xlu0.b32.cont [5/16] %v243_v17, 128  ;;  %v319_v19 = vpop.trf.xlu0  ;;  %v276_v16 = vld [vmem:[%s1180_s30 + $0x348] sm:$0xff]  ;;  %v275_v17 = vld [vmem:[%s1180_s30 + $0x340] sm:$0xff] }
  0xd1   : > { %635 = vst [vmem:[%s1254_s21 + $0x280] sm:$0xff] %v351_v18  ;;  %571 = vst [vmem:[%s1254_s21 + $0x80] sm:$0xff] %v319_v19 }
  0xd4   : > { %464 = vxpose.xlu1.b32.cont [6/16] %v246_v20, 128  ;;  %v352_v22 = vpop.trf.xlu1  ;;  %432 = vxpose.xlu0.b32.cont [6/16] %v245_v21, 128  ;;  %v320_v23 = vpop.trf.xlu0  ;;  %v278_v20 = vld [vmem:[%s1180_s30 + $0x358] sm:$0xff]  ;;  %v277_v21 = vld [vmem:[%s1180_s30 + $0x350] sm:$0xff] }
  0xd5   : > { %639 = vst [vmem:[%s1254_s21 + $0x2a0] sm:$0xff] %v352_v22  ;;  %575 = vst [vmem:[%s1254_s21 + $0xa0] sm:$0xff] %v320_v23 }
  0xd8   : > { %465 = vxpose.xlu1.b32.cont [7/16] %v248_v24, 128  ;;  %v353_v26 = vpop.trf.xlu1  ;;  %433 = vxpose.xlu0.b32.cont [7/16] %v247_v25, 128  ;;  %v321_v27 = vpop.trf.xlu0  ;;  %v280_v24 = vld [vmem:[%s1180_s30 + $0x368] sm:$0xff]  ;;  %v279_v25 = vld [vmem:[%s1180_s30 + $0x360] sm:$0xff] }
  0xd9   : > { %643 = vst [vmem:[%s1254_s21 + $0x2c0] sm:$0xff] %v353_v26  ;;  %579 = vst [vmem:[%s1254_s21 + $0xc0] sm:$0xff] %v321_v27 }
  0xdc   : > { %466 = vxpose.xlu1.b32.cont [8/16] %v250_v28, 128  ;;  %v354_v30 = vpop.trf.xlu1  ;;  %434 = vxpose.xlu0.b32.cont [8/16] %v249_v29, 128  ;;  %v322_v31 = vpop.trf.xlu0  ;;  %v282_v28 = vld [vmem:[%s1180_s30 + $0x378] sm:$0xff]  ;;  %v281_v29 = vld [vmem:[%s1180_s30 + $0x370] sm:$0xff] }
  0xdd   : > { %647 = vst [vmem:[%s1254_s21 + $0x2e0] sm:$0xff] %v354_v30  ;;  %583 = vst [vmem:[%s1254_s21 + $0xe0] sm:$0xff] %v322_v31 }
  0xe0   : > { %467 = vxpose.xlu1.b32.cont [9/16] %v252_v32, 128  ;;  %v355_v34 = vpop.trf.xlu1  ;;  %435 = vxpose.xlu0.b32.cont [9/16] %v251_v33, 128  ;;  %v323_v35 = vpop.trf.xlu0  ;;  %v284_v32 = vld [vmem:[%s1180_s30 + $0x388] sm:$0xff]  ;;  %v283_v33 = vld [vmem:[%s1180_s30 + $0x380] sm:$0xff] }
  0xe1   : > { %651 = vst [vmem:[%s1254_s21 + $0x300] sm:$0xff] %v355_v34  ;;  %587 = vst [vmem:[%s1254_s21 + $0x100] sm:$0xff] %v323_v35 }
  0xe4   : > { %468 = vxpose.xlu1.b32.cont [10/16] %v254_v36, 128  ;;  %v356_v38 = vpop.trf.xlu1  ;;  %436 = vxpose.xlu0.b32.cont [10/16] %v253_v37, 128  ;;  %v324_v39 = vpop.trf.xlu0  ;;  %v286_v36 = vld [vmem:[%s1180_s30 + $0x398] sm:$0xff]  ;;  %v285_v37 = vld [vmem:[%s1180_s30 + $0x390] sm:$0xff] }
  0xe5   : > { %655 = vst [vmem:[%s1254_s21 + $0x320] sm:$0xff] %v356_v38  ;;  %591 = vst [vmem:[%s1254_s21 + $0x120] sm:$0xff] %v324_v39 }
  0xe8   : > { %469 = vxpose.xlu1.b32.cont [11/16] %v256_v40, 128  ;;  %v357_v42 = vpop.trf.xlu1  ;;  %437 = vxpose.xlu0.b32.cont [11/16] %v255_v41, 128  ;;  %v325_v43 = vpop.trf.xlu0  ;;  %v288_v40 = vld [vmem:[%s1180_s30 + $0x3a8] sm:$0xff]  ;;  %v287_v41 = vld [vmem:[%s1180_s30 + $0x3a0] sm:$0xff] }
  0xe9   : > { %659 = vst [vmem:[%s1254_s21 + $0x340] sm:$0xff] %v357_v42  ;;  %595 = vst [vmem:[%s1254_s21 + $0x140] sm:$0xff] %v325_v43 }
  0xec   : > { %470 = vxpose.xlu1.b32.cont [12/16] %v258_v44, 128  ;;  %v358_v46 = vpop.trf.xlu1  ;;  %438 = vxpose.xlu0.b32.cont [12/16] %v257_v45, 128  ;;  %v326_v47 = vpop.trf.xlu0  ;;  %v290_v44 = vld [vmem:[%s1180_s30 + $0x3b8] sm:$0xff]  ;;  %v289_v45 = vld [vmem:[%s1180_s30 + $0x3b0] sm:$0xff] }
  0xed   : > { %663 = vst [vmem:[%s1254_s21 + $0x360] sm:$0xff] %v358_v46  ;;  %599 = vst [vmem:[%s1254_s21 + $0x160] sm:$0xff] %v326_v47 }
  0xf0   : > { %471 = vxpose.xlu1.b32.cont [13/16] %v260_v48, 128  ;;  %v359_v50 = vpop.trf.xlu1  ;;  %439 = vxpose.xlu0.b32.cont [13/16] %v259_v49, 128  ;;  %v327_v51 = vpop.trf.xlu0  ;;  %v292_v48 = vld [vmem:[%s1180_s30 + $0x3c8] sm:$0xff]  ;;  %v291_v49 = vld [vmem:[%s1180_s30 + $0x3c0] sm:$0xff] }
  0xf1   : > { %667 = vst [vmem:[%s1254_s21 + $0x380] sm:$0xff] %v359_v50  ;;  %603 = vst [vmem:[%s1254_s21 + $0x180] sm:$0xff] %v327_v51 }
  0xf4   : > { %472 = vxpose.xlu1.b32.cont [14/16] %v262_v52, 128  ;;  %v360_v54 = vpop.trf.xlu1  ;;  %440 = vxpose.xlu0.b32.cont [14/16] %v261_v53, 128  ;;  %v328_v55 = vpop.trf.xlu0  ;;  %v294_v52 = vld [vmem:[%s1180_s30 + $0x3d8] sm:$0xff]  ;;  %v293_v53 = vld [vmem:[%s1180_s30 + $0x3d0] sm:$0xff] }
  0xf5   : > { %671 = vst [vmem:[%s1254_s21 + $0x3a0] sm:$0xff] %v360_v54  ;;  %607 = vst [vmem:[%s1254_s21 + $0x1a0] sm:$0xff] %v328_v55 }
  0xf8   : > { %473 = vxpose.xlu1.b32.cont [15/16] %v264_v56, 128  ;;  %v361_v58 = vpop.trf.xlu1  ;;  %441 = vxpose.xlu0.b32.cont [15/16] %v263_v57, 128  ;;  %v329_v59 = vpop.trf.xlu0  ;;  %v296_v56 = vld [vmem:[%s1180_s30 + $0x3e8] sm:$0xff]  ;;  %v295_v57 = vld [vmem:[%s1180_s30 + $0x3e0] sm:$0xff] }
  0xf9   : > { %675 = vst [vmem:[%s1254_s21 + $0x3c0] sm:$0xff] %v361_v58  ;;  %611 = vst [vmem:[%s1254_s21 + $0x1c0] sm:$0xff] %v329_v59 }
  0xfc   : > { %474 = vxpose.xlu1.b32.end [16/16] %v266_v60, 128  ;;  %v362_v62 = vpop.trf.xlu1  ;;  %442 = vxpose.xlu0.b32.end [16/16] %v265_v61, 128  ;;  %v330_v63 = vpop.trf.xlu0  ;;  %v298_v60 = vld [vmem:[%s1180_s30 + $0x3f8] sm:$0xff]  ;;  %v297_v61 = vld [vmem:[%s1180_s30 + $0x3f0] sm:$0xff] }
  0xfd   : > { %679 = vst [vmem:[%s1254_s21 + $0x3e0] sm:$0xff] %v362_v62  ;;  %615 = vst [vmem:[%s1254_s21 + $0x1e0] sm:$0xff] %v330_v63 }
 0x100   : > { %523 = vxpose.xlu1.b32.start [1/16] %v268_v0, 128  ;;  %v411_v2 = vpop.trf.xlu1  ;;  %491 = vxpose.xlu0.b32.start [1/16] %v267_v1, 128  ;;  %v379_v3 = vpop.trf.xlu0 }
 0x101   : > { %620 = vst [vmem:[%s1254_s21 + $0x208] sm:$0xff] %v411_v2  ;;  %556 = vst [vmem:[%s1254_s21 + $0x8] sm:$0xff] %v379_v3 }
 0x104   : > { %524 = vxpose.xlu1.b32.cont [2/16] %v270_v4, 128  ;;  %v412_v6 = vpop.trf.xlu1  ;;  %492 = vxpose.xlu0.b32.cont [2/16] %v269_v5, 128  ;;  %v380_v7 = vpop.trf.xlu0 }
 0x105   : > { %624 = vst [vmem:[%s1254_s21 + $0x228] sm:$0xff] %v412_v6  ;;  %560 = vst [vmem:[%s1254_s21 + $0x28] sm:$0xff] %v380_v7 }
 0x108   : > { %525 = vxpose.xlu1.b32.cont [3/16] %v272_v8, 128  ;;  %v413_v10 = vpop.trf.xlu1  ;;  %493 = vxpose.xlu0.b32.cont [3/16] %v271_v9, 128  ;;  %v381_v11 = vpop.trf.xlu0 }
 0x109   : > { %628 = vst [vmem:[%s1254_s21 + $0x248] sm:$0xff] %v413_v10  ;;  %564 = vst [vmem:[%s1254_s21 + $0x48] sm:$0xff] %v381_v11 }
 0x10c   : > { %526 = vxpose.xlu1.b32.cont [4/16] %v274_v12, 128  ;;  %v414_v14 = vpop.trf.xlu1  ;;  %494 = vxpose.xlu0.b32.cont [4/16] %v273_v13, 128  ;;  %v382_v15 = vpop.trf.xlu0 }
 0x10d   : > { %632 = vst [vmem:[%s1254_s21 + $0x268] sm:$0xff] %v414_v14  ;;  %568 = vst [vmem:[%s1254_s21 + $0x68] sm:$0xff] %v382_v15 }
 0x110   : > { %527 = vxpose.xlu1.b32.cont [5/16] %v276_v16, 128  ;;  %v415_v18 = vpop.trf.xlu1  ;;  %495 = vxpose.xlu0.b32.cont [5/16] %v275_v17, 128  ;;  %v383_v19 = vpop.trf.xlu0 }
 0x111   : > { %636 = vst [vmem:[%s1254_s21 + $0x288] sm:$0xff] %v415_v18  ;;  %572 = vst [vmem:[%s1254_s21 + $0x88] sm:$0xff] %v383_v19 }
 0x114   : > { %528 = vxpose.xlu1.b32.cont [6/16] %v278_v20, 128  ;;  %v416_v22 = vpop.trf.xlu1  ;;  %496 = vxpose.xlu0.b32.cont [6/16] %v277_v21, 128  ;;  %v384_v23 = vpop.trf.xlu0 }
 0x115   : > { %640 = vst [vmem:[%s1254_s21 + $0x2a8] sm:$0xff] %v416_v22  ;;  %576 = vst [vmem:[%s1254_s21 + $0xa8] sm:$0xff] %v384_v23 }
 0x118   : > { %529 = vxpose.xlu1.b32.cont [7/16] %v280_v24, 128  ;;  %v417_v26 = vpop.trf.xlu1  ;;  %497 = vxpose.xlu0.b32.cont [7/16] %v279_v25, 128  ;;  %v385_v27 = vpop.trf.xlu0 }
 0x119   : > { %644 = vst [vmem:[%s1254_s21 + $0x2c8] sm:$0xff] %v417_v26  ;;  %580 = vst [vmem:[%s1254_s21 + $0xc8] sm:$0xff] %v385_v27 }
 0x11c   : > { %530 = vxpose.xlu1.b32.cont [8/16] %v282_v28, 128  ;;  %v418_v30 = vpop.trf.xlu1  ;;  %498 = vxpose.xlu0.b32.cont [8/16] %v281_v29, 128  ;;  %v386_v31 = vpop.trf.xlu0 }
 0x11d   : > { %648 = vst [vmem:[%s1254_s21 + $0x2e8] sm:$0xff] %v418_v30  ;;  %584 = vst [vmem:[%s1254_s21 + $0xe8] sm:$0xff] %v386_v31 }
 0x120   : > { %531 = vxpose.xlu1.b32.cont [9/16] %v284_v32, 128  ;;  %v419_v34 = vpop.trf.xlu1  ;;  %499 = vxpose.xlu0.b32.cont [9/16] %v283_v33, 128  ;;  %v387_v35 = vpop.trf.xlu0 }
 0x121   : > { %652 = vst [vmem:[%s1254_s21 + $0x308] sm:$0xff] %v419_v34  ;;  %588 = vst [vmem:[%s1254_s21 + $0x108] sm:$0xff] %v387_v35 }
 0x124   : > { %532 = vxpose.xlu1.b32.cont [10/16] %v286_v36, 128  ;;  %v420_v38 = vpop.trf.xlu1  ;;  %500 = vxpose.xlu0.b32.cont [10/16] %v285_v37, 128  ;;  %v388_v39 = vpop.trf.xlu0 }
 0x125   : > { %656 = vst [vmem:[%s1254_s21 + $0x328] sm:$0xff] %v420_v38  ;;  %592 = vst [vmem:[%s1254_s21 + $0x128] sm:$0xff] %v388_v39 }
 0x128   : > { %533 = vxpose.xlu1.b32.cont [11/16] %v288_v40, 128  ;;  %v421_v42 = vpop.trf.xlu1  ;;  %501 = vxpose.xlu0.b32.cont [11/16] %v287_v41, 128  ;;  %v389_v43 = vpop.trf.xlu0 }
 0x129   : > { %660 = vst [vmem:[%s1254_s21 + $0x348] sm:$0xff] %v421_v42  ;;  %596 = vst [vmem:[%s1254_s21 + $0x148] sm:$0xff] %v389_v43 }
 0x12c   : > { %534 = vxpose.xlu1.b32.cont [12/16] %v290_v44, 128  ;;  %v422_v46 = vpop.trf.xlu1  ;;  %502 = vxpose.xlu0.b32.cont [12/16] %v289_v45, 128  ;;  %v390_v47 = vpop.trf.xlu0 }
 0x12d   : > { %664 = vst [vmem:[%s1254_s21 + $0x368] sm:$0xff] %v422_v46  ;;  %600 = vst [vmem:[%s1254_s21 + $0x168] sm:$0xff] %v390_v47 }
 0x130   : > { %535 = vxpose.xlu1.b32.cont [13/16] %v292_v48, 128  ;;  %v423_v50 = vpop.trf.xlu1  ;;  %503 = vxpose.xlu0.b32.cont [13/16] %v291_v49, 128  ;;  %v391_v51 = vpop.trf.xlu0 }
 0x131   : > { %668 = vst [vmem:[%s1254_s21 + $0x388] sm:$0xff] %v423_v50  ;;  %604 = vst [vmem:[%s1254_s21 + $0x188] sm:$0xff] %v391_v51 }
 0x134   : > { %536 = vxpose.xlu1.b32.cont [14/16] %v294_v52, 128  ;;  %v424_v54 = vpop.trf.xlu1  ;;  %504 = vxpose.xlu0.b32.cont [14/16] %v293_v53, 128  ;;  %v392_v55 = vpop.trf.xlu0 }
 0x135   : > { %672 = vst [vmem:[%s1254_s21 + $0x3a8] sm:$0xff] %v424_v54  ;;  %608 = vst [vmem:[%s1254_s21 + $0x1a8] sm:$0xff] %v392_v55 }
 0x138   : > { %537 = vxpose.xlu1.b32.cont [15/16] %v296_v56, 128  ;;  %v425_v58 = vpop.trf.xlu1  ;;  %505 = vxpose.xlu0.b32.cont [15/16] %v295_v57, 128  ;;  %v393_v59 = vpop.trf.xlu0 }
 0x139   : > { %676 = vst [vmem:[%s1254_s21 + $0x3c8] sm:$0xff] %v425_v58  ;;  %612 = vst [vmem:[%s1254_s21 + $0x1c8] sm:$0xff] %v393_v59 }
 0x13c   : > { %538 = vxpose.xlu1.b32.end [16/16] %v298_v60, 128  ;;  %v426_v62 = vpop.trf.xlu1  ;;  %506 = vxpose.xlu0.b32.end [16/16] %v297_v61, 128  ;;  %v394_v63 = vpop.trf.xlu0 }
 0x13d   : > { %680 = vst [vmem:[%s1254_s21 + $0x3e8] sm:$0xff] %v426_v62  ;;  %616 = vst [vmem:[%s1254_s21 + $0x1e8] sm:$0xff] %v394_v63 }
 0x140   : > { %v475_v0 = vpop.trf.xlu1  ;;  %v443_v1 = vpop.trf.xlu0 }
 0x141   : > { %621 = vst [vmem:[%s1254_s21 + $0x210] sm:$0xff] %v475_v0  ;;  %557 = vst [vmem:[%s1254_s21 + $0x10] sm:$0xff] %v443_v1 }
 0x144   : > { %v476_v2 = vpop.trf.xlu1  ;;  %v444_v3 = vpop.trf.xlu0 }
 0x145   : > { %625 = vst [vmem:[%s1254_s21 + $0x230] sm:$0xff] %v476_v2  ;;  %561 = vst [vmem:[%s1254_s21 + $0x30] sm:$0xff] %v444_v3 }
 0x148   : > { %v477_v4 = vpop.trf.xlu1  ;;  %v445_v5 = vpop.trf.xlu0 }
 0x149   : > { %629 = vst [vmem:[%s1254_s21 + $0x250] sm:$0xff] %v477_v4  ;;  %565 = vst [vmem:[%s1254_s21 + $0x50] sm:$0xff] %v445_v5 }
 0x14c   : > { %v478_v6 = vpop.trf.xlu1  ;;  %v446_v7 = vpop.trf.xlu0 }
 0x14d   : > { %633 = vst [vmem:[%s1254_s21 + $0x270] sm:$0xff] %v478_v6  ;;  %569 = vst [vmem:[%s1254_s21 + $0x70] sm:$0xff] %v446_v7 }
 0x150   : > { %v479_v8 = vpop.trf.xlu1  ;;  %v447_v9 = vpop.trf.xlu0 }
 0x151   : > { %637 = vst [vmem:[%s1254_s21 + $0x290] sm:$0xff] %v479_v8  ;;  %573 = vst [vmem:[%s1254_s21 + $0x90] sm:$0xff] %v447_v9 }
 0x154   : > { %v480_v10 = vpop.trf.xlu1  ;;  %v448_v11 = vpop.trf.xlu0 }
 0x155   : > { %641 = vst [vmem:[%s1254_s21 + $0x2b0] sm:$0xff] %v480_v10  ;;  %577 = vst [vmem:[%s1254_s21 + $0xb0] sm:$0xff] %v448_v11 }
 0x158   : > { %v481_v12 = vpop.trf.xlu1  ;;  %v449_v13 = vpop.trf.xlu0 }
 0x159   : > { %645 = vst [vmem:[%s1254_s21 + $0x2d0] sm:$0xff] %v481_v12  ;;  %581 = vst [vmem:[%s1254_s21 + $0xd0] sm:$0xff] %v449_v13 }
 0x15c   : > { %v482_v14 = vpop.trf.xlu1  ;;  %v450_v15 = vpop.trf.xlu0 }
 0x15d   : > { %649 = vst [vmem:[%s1254_s21 + $0x2f0] sm:$0xff] %v482_v14  ;;  %585 = vst [vmem:[%s1254_s21 + $0xf0] sm:$0xff] %v450_v15 }
 0x160   : > { %v483_v16 = vpop.trf.xlu1  ;;  %v451_v17 = vpop.trf.xlu0 }
 0x161   : > { %653 = vst [vmem:[%s1254_s21 + $0x310] sm:$0xff] %v483_v16  ;;  %589 = vst [vmem:[%s1254_s21 + $0x110] sm:$0xff] %v451_v17 }
 0x164   : > { %v484_v18 = vpop.trf.xlu1  ;;  %v452_v19 = vpop.trf.xlu0 }
 0x165   : > { %657 = vst [vmem:[%s1254_s21 + $0x330] sm:$0xff] %v484_v18  ;;  %593 = vst [vmem:[%s1254_s21 + $0x130] sm:$0xff] %v452_v19 }
 0x168   : > { %v485_v20 = vpop.trf.xlu1  ;;  %v453_v21 = vpop.trf.xlu0 }
 0x169   : > { %661 = vst [vmem:[%s1254_s21 + $0x350] sm:$0xff] %v485_v20  ;;  %597 = vst [vmem:[%s1254_s21 + $0x150] sm:$0xff] %v453_v21 }
 0x16c   : > { %v486_v22 = vpop.trf.xlu1  ;;  %v454_v23 = vpop.trf.xlu0 }
 0x16d   : > { %665 = vst [vmem:[%s1254_s21 + $0x370] sm:$0xff] %v486_v22  ;;  %601 = vst [vmem:[%s1254_s21 + $0x170] sm:$0xff] %v454_v23 }
 0x170   : > { %v487_v24 = vpop.trf.xlu1  ;;  %v455_v25 = vpop.trf.xlu0 }
 0x171   : > { %669 = vst [vmem:[%s1254_s21 + $0x390] sm:$0xff] %v487_v24  ;;  %605 = vst [vmem:[%s1254_s21 + $0x190] sm:$0xff] %v455_v25 }
 0x174   : > { %v488_v26 = vpop.trf.xlu1  ;;  %v456_v27 = vpop.trf.xlu0 }
 0x175   : > { %673 = vst [vmem:[%s1254_s21 + $0x3b0] sm:$0xff] %v488_v26  ;;  %609 = vst [vmem:[%s1254_s21 + $0x1b0] sm:$0xff] %v456_v27 }
 0x178   : > { %v489_v28 = vpop.trf.xlu1  ;;  %v457_v29 = vpop.trf.xlu0 }
 0x179   : > { %677 = vst [vmem:[%s1254_s21 + $0x3d0] sm:$0xff] %v489_v28  ;;  %613 = vst [vmem:[%s1254_s21 + $0x1d0] sm:$0xff] %v457_v29 }
 0x17c   : > { %v490_v30 = vpop.trf.xlu1  ;;  %v458_v31 = vpop.trf.xlu0 }
 0x17d   : > { %681 = vst [vmem:[%s1254_s21 + $0x3f0] sm:$0xff] %v490_v30  ;;  %617 = vst [vmem:[%s1254_s21 + $0x1f0] sm:$0xff] %v458_v31 }
 0x180   : > { %v539_v32 = vpop.trf.xlu1  ;;  %v507_v33 = vpop.trf.xlu0 }
 0x181   : > { %622 = vst [vmem:[%s1254_s21 + $0x218] sm:$0xff] %v539_v32  ;;  %558 = vst [vmem:[%s1254_s21 + $0x18] sm:$0xff] %v507_v33 }
 0x184   : > { %v540_v34 = vpop.trf.xlu1  ;;  %v508_v35 = vpop.trf.xlu0 }
 0x185   : > { %626 = vst [vmem:[%s1254_s21 + $0x238] sm:$0xff] %v540_v34  ;;  %562 = vst [vmem:[%s1254_s21 + $0x38] sm:$0xff] %v508_v35 }
 0x188   : > { %v541_v36 = vpop.trf.xlu1  ;;  %v509_v37 = vpop.trf.xlu0 }
 0x189   : > { %630 = vst [vmem:[%s1254_s21 + $0x258] sm:$0xff] %v541_v36  ;;  %566 = vst [vmem:[%s1254_s21 + $0x58] sm:$0xff] %v509_v37 }
 0x18c   : > { %v542_v38 = vpop.trf.xlu1  ;;  %v510_v39 = vpop.trf.xlu0 }
 0x18d   : > { %634 = vst [vmem:[%s1254_s21 + $0x278] sm:$0xff] %v542_v38  ;;  %570 = vst [vmem:[%s1254_s21 + $0x78] sm:$0xff] %v510_v39 }
 0x190   : > { %v543_v40 = vpop.trf.xlu1  ;;  %v511_v41 = vpop.trf.xlu0 }
 0x191   : > { %638 = vst [vmem:[%s1254_s21 + $0x298] sm:$0xff] %v543_v40  ;;  %574 = vst [vmem:[%s1254_s21 + $0x98] sm:$0xff] %v511_v41 }
 0x194   : > { %v544_v42 = vpop.trf.xlu1  ;;  %v512_v43 = vpop.trf.xlu0 }
 0x195   : > { %642 = vst [vmem:[%s1254_s21 + $0x2b8] sm:$0xff] %v544_v42  ;;  %578 = vst [vmem:[%s1254_s21 + $0xb8] sm:$0xff] %v512_v43 }
 0x198   : > { %v545_v44 = vpop.trf.xlu1  ;;  %v513_v45 = vpop.trf.xlu0 }
 0x199   : > { %646 = vst [vmem:[%s1254_s21 + $0x2d8] sm:$0xff] %v545_v44  ;;  %582 = vst [vmem:[%s1254_s21 + $0xd8] sm:$0xff] %v513_v45 }
 0x19c   : > { %v546_v46 = vpop.trf.xlu1  ;;  %v514_v47 = vpop.trf.xlu0 }
 0x19d   : > { %650 = vst [vmem:[%s1254_s21 + $0x2f8] sm:$0xff] %v546_v46  ;;  %586 = vst [vmem:[%s1254_s21 + $0xf8] sm:$0xff] %v514_v47 }
 0x1a0   : > { %v547_v48 = vpop.trf.xlu1  ;;  %v515_v49 = vpop.trf.xlu0 }
 0x1a1   : > { %654 = vst [vmem:[%s1254_s21 + $0x318] sm:$0xff] %v547_v48  ;;  %590 = vst [vmem:[%s1254_s21 + $0x118] sm:$0xff] %v515_v49 }
 0x1a4   : > { %v548_v50 = vpop.trf.xlu1  ;;  %v516_v51 = vpop.trf.xlu0 }
 0x1a5   : > { %658 = vst [vmem:[%s1254_s21 + $0x338] sm:$0xff] %v548_v50  ;;  %594 = vst [vmem:[%s1254_s21 + $0x138] sm:$0xff] %v516_v51 }
 0x1a8   : > { %v549_v52 = vpop.trf.xlu1  ;;  %v517_v53 = vpop.trf.xlu0 }
 0x1a9   : > { %662 = vst [vmem:[%s1254_s21 + $0x358] sm:$0xff] %v549_v52  ;;  %598 = vst [vmem:[%s1254_s21 + $0x158] sm:$0xff] %v517_v53 }
 0x1ac   : > { %v550_v54 = vpop.trf.xlu1  ;;  %v518_v55 = vpop.trf.xlu0 }
 0x1ad   : > { %666 = vst [vmem:[%s1254_s21 + $0x378] sm:$0xff] %v550_v54  ;;  %602 = vst [vmem:[%s1254_s21 + $0x178] sm:$0xff] %v518_v55 }
 0x1b0   : > { %v551_v56 = vpop.trf.xlu1  ;;  %v519_v57 = vpop.trf.xlu0 }
 0x1b1   : > { %670 = vst [vmem:[%s1254_s21 + $0x398] sm:$0xff] %v551_v56  ;;  %606 = vst [vmem:[%s1254_s21 + $0x198] sm:$0xff] %v519_v57 }
 0x1b4   : > { %v552_v58 = vpop.trf.xlu1  ;;  %v520_v59 = vpop.trf.xlu0 }
 0x1b5   : > { %674 = vst [vmem:[%s1254_s21 + $0x3b8] sm:$0xff] %v552_v58  ;;  %610 = vst [vmem:[%s1254_s21 + $0x1b8] sm:$0xff] %v520_v59 }
 0x1b8   : > { %v553_v60 = vpop.trf.xlu1  ;;  %v521_v61 = vpop.trf.xlu0 }
 0x1b9   : > { %678 = vst [vmem:[%s1254_s21 + $0x3d8] sm:$0xff] %v553_v60  ;;  %614 = vst [vmem:[%s1254_s21 + $0x1d8] sm:$0xff] %v521_v61 }
 0x1bc   : > { %v554_v62 = vpop.trf.xlu1  ;;  %v522_v63 = vpop.trf.xlu0 }
 0x1bd   : > { %682 = vst [vmem:[%s1254_s21 + $0x3f8] sm:$0xff] %v554_v62  ;;  %618 = vst [vmem:[%s1254_s21 + $0x1f8] sm:$0xff] %v522_v63 }
 0x1be   : > { %944 = shalt.err (!%p941_p3)
}
 0x1bf   : > { %s945_s28 = scalar_lea.hbm %s1450_s10, 16384  ;;  %s949_s21 = scalar_lea.hbm %s1509_s1, 65536 }
 0x1c0   : > { %p946_p5 = scmp.ne.s32.totalorder %s1450_s10, %s945_s28  ;;  %p950_p2 = scmp.lt.u32.totalorder %s1450_s10, %s1509_s1 }
 0x1c1   : > { %p951_p4 = scmp.lt.u32.totalorder %s949_s21, %s945_s28  ;;  %p953_p8 = scmp.lt.u32.totalorder %s945_s28, %s1450_s10 }
 0x1c2   : > { %p947_p6 = pnand %p946_p5, %p1516_p9 }
 0x1c3   : > { %p952_p10 = por %p951_p4, %p950_p2 }
 0x1c4   : > { %p948_p7 = pneg %p947_p6 }
 0x1c5   : > { %p954_p12 = por %p953_p8, %p952_p10 }
 0x1c7   : > { %p955_p0 = pnand %p954_p12, %p948_p7 }
 0x1c9   : > { %958 = shalt.err (!%p955_p0)
}
 0x1ca   : > { %s1035_s18 = smov 512   ;;  %s1036_s23 = smov 1024  }
 0x1cb   : > { %s1037_s26 = smov 32  }
 0x1cc   : > { %820 = dma.vmem_to_hbm [thread:$0]  (%p1516_p9), %s1452_s2, 16384, %s1450_s10, %s684_s4, %s1035_s18, %s1036_s23, %s1037_s26  }
 0x1cd PF: > { %p831_p11 = scmp.ge.s32.totalorder %s1029_s13, 2  ;;  %s717_s9 = sand.u32 1, %s1001_s6  }
 0x1ce   : > { %p1517_p13 = scmp.ne.s32.totalorder %s1514_s25, 0  ;;  %s718_s5 = scalar_lea.sflag [#allocation4], %s717_s9 }
 0x1d0   : > { %p827_p1 = pnand %p831_p11, %p1517_p13 }
 0x1d2   : > { %996 = dma.done.wait (!%p827_p1), %s718_s5, 16384  }
 0x1d3   : > { %998 = vsyncadd (!%p827_p1), %s718_s5, 4294950912  ;;  %s17_s13 = sadd.s32 1, %s1029_s13   ;;  %s1518_s6 = smov %s1005_s7 }
 0x1d4   : > { %p14_p3 = scmp.ge.s32.totalorder %s17_s13, 6   ;;  %s1519_s7 = smov %s1009_s8 }
 0x1d5   : > { %s1520_s8 = smov %s1126_s27  ;;  %s1521_s9 = smov %s1021_s11 }
 0x1d6   : > { %s1522_s10 = smov %s1025_s12  ;;  %s1523_s11 = smov %s1526_s16 }
 0x1d7   : > { %s1524_s12 = smov %s1530_s17  ;;  %16 = sbr.rel (!%p14_p3) target bundleno = 7 (0x7), region = 69 }
 0x1de   :  { %723 = vsyncpa [#allocation3], 1 }
 0x1df   :  { %725 = vsyncpa [#allocation3 + $0x1], 1 }
 0x1e0   :  { %726 = vsyncpa [#allocation4], 1 }
 0x1e1   :  { %728 = vsyncpa [#allocation4 + $0x1], 1 }

</bundles_post_ra>
